<compile_context>
chip_gen: v6e
topology: v6e:2x2x1
jax: 0.10.0
libtpu: 0.0.40
codegen_flags: <defaults>
</compile_context>

<pallas_src>
import math

import numpy as np
import jax
import jax.numpy as jnp
from jax.experimental import pallas as pl
from jax.experimental.pallas import tpu as pltpu

LEAK = 0.2            # LeakyReLU slope
KSIZE = 5             # transposed-conv kernel size
PAD = 2               # transposed-conv padding
EPS = 1e-5            # BatchNorm eps
BINARY_AMP = 100.0    # params.binary_amp set in forward()
MXU_DTYPE = jnp.bfloat16   # matmul-operand dtype (set to jnp.float32 for exact f32)

VMEM_SPEC = pl.BlockSpec(memory_space=pltpu.MemorySpace.VMEM)


def _leaky(x):
    return jnp.where(x > 0, x, LEAK * x)


# ----------------------------------------------------------------------------
# Fused kernel: the whole Generator forward = six lane-dense (N,d)@(d,d) matmuls
# ----------------------------------------------------------------------------
def _generator_kernel(noise_ref, a1_ref, b1_ref, a2_ref, b2_ref,
                      k1_ref, b3_ref, k2_ref, b4_ref, k3_ref, o_ref):
    x = noise_ref[...]                                     # (n, d) f32

    def mm(h, w_ref):
        w = w_ref[...]
        # bf16 MXU operands, f32 accumulation; element-wise math stays f32.
        return jnp.dot(h.astype(w.dtype), w, preferred_element_type=jnp.float32)

    h = _leaky(mm(x, a1_ref) + b1_ref[...])                # Linear + LeakyReLU
    # TODO(synk): Dropout(p=0.2) training-mode randomness not implemented
    # (eval-mode identity).
    h = _leaky(mm(h, a2_ref) + b2_ref[...])                # Linear(no bias) + BN1d folded + LeakyReLU
    h = _leaky(mm(h, k1_ref) + b3_ref[...])                # ConvT 64->16 + BN2d(16) folded + LeakyReLU
    h = _leaky(mm(h, k2_ref) + b4_ref[...])                # ConvT 16->4  + BN2d(4)  folded + LeakyReLU
    h = mm(h, k3_ref)                                      # ConvT 4->1
    # Fused epilogue: tanh((net + noise) * binary_amp) * 1.05, lane-dense store.
    o_ref[...] = (jnp.tanh((h + x) * BINARY_AMP) * 1.05).astype(o_ref.dtype)


def generator_forward(noise, prep):
    """noise: (N, noise_dim) f32; prep: output of prepare_params()."""
    n, d = noise.shape
    # Grid-free: total operand footprint is < 1 MiB, far below VMEM on all gens
    # (incl. v7x's 64 MiB).  M = batch = 2 underutilizes the MXU M-dim; that is
    # inherent to the batch size (see perf review).  If batch ever grows, add a
    # leading grid axis over batch with dimension_semantics=("parallel",) to
    # also engage v7x's second TensorCore.
    out = pl.pallas_call(
        _generator_kernel,
        out_shape=jax.ShapeDtypeStruct((n, d), jnp.float32),
        in_specs=[VMEM_SPEC] * 10,
        out_specs=VMEM_SPEC,
    )(noise, prep["a1"], prep["b1"], prep["a2"], prep["b2"],
      prep["k1"], prep["b3"], prep["k2"], prep["b4"], prep["k3"])
    return out.reshape(n, 1, d)       # matches torch output shape (N, 1, noise_dim)


# ----------------------------------------------------------------------------
# One-time parameter preparation (hoisted out of the forward path)
# ----------------------------------------------------------------------------
def _convt_dense(w, hh, ww):
    """Dense matrix of ConvTranspose2d(k=5, s=2, p=2, op=1, bias=False).

    w: (Ci, Co, 5, 5) PyTorch layout.  Returns M of shape (Ci*hh*ww, Co*2hh*2ww)
    such that flatten_NCHW(y) = flatten_NCHW(x) @ M, using the PyTorch relation
    oy = 2*iy + ky - PAD (out-of-range contributions dropped).
    """
    ci, co, k, _ = w.shape
    oh, ow = 2 * hh, 2 * ww
    m = np.zeros((ci, hh, ww, co, oh, ow), np.float32)
    for iy in range(hh):
        for ky in range(k):
            oy = 2 * iy + ky - PAD
            if not 0 <= oy < oh:
                continue
            for ix in range(ww):
                for kx in range(k):
                    ox = 2 * ix + kx - PAD
                    if 0 <= ox < ow:
                        m[:, iy, ix, :, oy, ox] = w[:, :, ky, kx]
    return m.reshape(ci * hh * ww, co * oh * ow)


def prepare_params(raw, noise_dim):
    """Fold BN, transpose Linears, and lower ConvTranspose2d layers to dense
    (d, d) matrices over flattened-NCHW activations.  Runs once, off the
    forward path."""
    d = noise_dim
    dimen = int(round(math.sqrt(d)))
    g = lambda name: np.asarray(raw[name], np.float32)

    def bn_fold(prefix):
        gamma, beta = g(prefix + "_gamma"), g(prefix + "_beta")
        mean, var = g(prefix + "_mean"), g(prefix + "_var")
        scale = gamma / np.sqrt(var + EPS)
        return scale, beta - mean * scale

    # FC1: Linear(d, d) with bias.  PyTorch: y = x @ W.T + b.
    a1 = g("fc1_weight").T.copy()
    b1 = g("fc1_bias")

    # FC2: Linear(d, d, bias=False) followed by eval-mode BatchNorm1d (folded).
    s1, t1 = bn_fold("bn1")
    a2 = g("fc2_weight").T * s1[None, :]
    b2 = t1

    # ConvTranspose layers as dense (d, d) matrices, BN2d folded into columns.
    h1 = dimen // 8
    s2, t2 = bn_fold("bn2")
    k1 = _convt_dense(g("ct1_weight"), h1, h1) * np.repeat(s2, (2 * h1) ** 2)[None, :]
    b3 = np.repeat(t2, (2 * h1) ** 2)

    h2 = dimen // 4
    s3, t3 = bn_fold("bn3")
    k2 = _convt_dense(g("ct2_weight"), h2, h2) * np.repeat(s3, (2 * h2) ** 2)[None, :]
    b4 = np.repeat(t3, (2 * h2) ** 2)

    h3 = dimen // 2
    k3 = _convt_dense(g("ct3_weight"), h3, h3)

    for mtx in (a1, a2, k1, k2, k3):
        assert mtx.shape == (d, d), mtx.shape

    wcast = lambda x: jnp.asarray(x, MXU_DTYPE)
    bcast = lambda x: jnp.asarray(x.reshape(1, d), jnp.float32)
    return {"a1": wcast(a1), "b1": bcast(b1),
            "a2": wcast(a2), "b2": bcast(b2),
            "k1": wcast(k1), "b3": bcast(b3),
            "k2": wcast(k2), "b4": bcast(b4),
            "k3": wcast(k3)}


# ----------------------------------------------------------------------------
# Raw parameters (PyTorch layouts) and a pure-JAX f32 reference for validation
# ----------------------------------------------------------------------------
def init_generator_params(key, noise_dim):
    dimen = int(round(math.sqrt(noise_dim)))
    assert dimen * dimen == noise_dim and dimen % 8 == 0
    ks = jax.random.split(key, 18)
    std = 0.05

    def rnd(k, shape, s=std):
        return jax.random.normal(k, shape, jnp.float32) * s

    return {
        # Linear weights in PyTorch layout (out, in)
        "fc1_weight": rnd(ks[0], (noise_dim, noise_dim)),
        "fc1_bias":   rnd(ks[1], (noise_dim,)),
        "fc2_weight": rnd(ks[2], (noise_dim, noise_dim)),
        # BatchNorm1d(noise_dim) running stats / affine (non-trivial, eval mode)
        "bn1_gamma": 1.0 + rnd(ks[3], (noise_dim,), 0.1),
        "bn1_beta":  rnd(ks[4], (noise_dim,), 0.1),
        "bn1_mean":  rnd(ks[5], (noise_dim,), 0.1),
        "bn1_var":   1.0 + jnp.abs(rnd(ks[6], (noise_dim,), 0.1)),
        # ConvTranspose2d weights in PyTorch layout (Cin, Cout, kH, kW)
        "ct1_weight": rnd(ks[7], (64, 16, KSIZE, KSIZE)),
        "ct2_weight": rnd(ks[8], (16, 4, KSIZE, KSIZE)),
        "ct3_weight": rnd(ks[9], (4, 1, KSIZE, KSIZE)),
        # BatchNorm2d(16)
        "bn2_gamma": 1.0 + rnd(ks[10], (16,), 0.1),
        "bn2_beta":  rnd(ks[11], (16,), 0.1),
        "bn2_mean":  rnd(ks[12], (16,), 0.1),
        "bn2_var":   1.0 + jnp.abs(rnd(ks[13], (16,), 0.1)),
        # BatchNorm2d(4)
        "bn3_gamma": 1.0 + rnd(ks[14], (4,), 0.1),
        "bn3_beta":  rnd(ks[15], (4,), 0.1),
        "bn3_mean":  rnd(ks[16], (4,), 0.1),
        "bn3_var":   1.0 + jnp.abs(rnd(ks[17], (4,), 0.1)),
    }


def _bn_eval(x, gamma, beta, mean, var, axis):
    shape = [1] * x.ndim
    shape[axis] = -1
    scale = gamma / jnp.sqrt(var + EPS)
    shift = beta - mean * scale
    return x * scale.reshape(shape) + shift.reshape(shape)


def _convt_ref(x, w):
    """ConvTranspose2d(k=5,s=2,p=2,op=1,bias=False): x (N,Ci,H,W), w (Ci,Co,5,5)."""
    w_oihw = jnp.flip(w, (2, 3)).transpose(1, 0, 2, 3)      # (Co, Ci, 5, 5)
    return jax.lax.conv_general_dilated(
        x, w_oihw, window_strides=(1, 1),
        padding=((PAD, PAD + 1), (PAD, PAD + 1)),            # (k-1-p, k-1-p+op)
        lhs_dilation=(2, 2),
        dimension_numbers=("NCHW", "OIHW", "NCHW"))


def reference_forward(noise, raw, noise_dim):
    """Pure-JAX f32 eval-mode reference of the original PyTorch formulation."""
    d = noise_dim
    dimen = int(round(math.sqrt(d)))
    n = noise.shape[0]
    h = noise @ raw["fc1_weight"].T + raw["fc1_bias"]
    h = jnp.where(h > 0, h, LEAK * h)
    h = h @ raw["fc2_weight"].T
    h = _bn_eval(h, raw["bn1_gamma"], raw["bn1_beta"], raw["bn1_mean"], raw["bn1_var"], 1)
    h = jnp.where(h > 0, h, LEAK * h)
    h = h.reshape(n, 64, dimen // 8, dimen // 8)
    h = _convt_ref(h, raw["ct1_weight"])
    h = _bn_eval(h, raw["bn2_gamma"], raw["bn2_beta"], raw["bn2_mean"], raw["bn2_var"], 1)
    h = jnp.where(h > 0, h, LEAK * h)
    h = _convt_ref(h, raw["ct2_weight"])
    h = _bn_eval(h, raw["bn3_gamma"], raw["bn3_beta"], raw["bn3_mean"], raw["bn3_var"], 1)
    h = jnp.where(h > 0, h, LEAK * h)
    h = _convt_ref(h, raw["ct3_weight"])
    h = h.reshape(n, 1, d)
    return jnp.tanh((h + noise[:, None, :]) * BINARY_AMP) * 1.05


# ----------------------------------------------------------------------------
if __name__ == "__main__":
    noise_dim = 256          # dimen = 16 (square with sqrt divisible by 8)
    batch = 2
    key = jax.random.PRNGKey(0)
    pkey, nkey = jax.random.split(key)

    raw_params = init_generator_params(pkey, noise_dim)
    prep = prepare_params(raw_params, noise_dim)          # one-time weight prep
    noise = jax.random.normal(nkey, (batch, noise_dim), jnp.float32)

    out = jax.jit(generator_forward)(noise, prep)
    jax.block_until_ready(out)

    assert out.shape == (batch, 1, noise_dim), out.shape
    assert bool(jnp.all(jnp.isfinite(out)))

    # Structural validation against a pure-JAX f32 reference.  The kernel uses
    # bf16 MXU operands and the model ends in tanh(100*x), so a handful of
    # near-zero-crossing elements may legitimately differ; a structural bug
    # (wrong dense-conv matrix / BN fold / layer order) would mismatch ~50%.
    ref = reference_forward(noise, raw_params, noise_dim)
    frac_match = float(jnp.mean(jnp.abs(out - ref) < 5e-2))
    assert frac_match > 0.90, f"only {frac_match:.3f} of outputs match reference"

    print("KERNEL_OK")
</pallas_src>

<mosaic_0001>
module attributes {stable_mosaic.version = 11 : i64} {
  func.func @_generator_kernel(%arg0: memref<2x256xf32, #tpu.memory_space<vmem>>, %arg1: memref<256x256xbf16, #tpu.memory_space<vmem>>, %arg2: memref<1x256xf32, #tpu.memory_space<vmem>>, %arg3: memref<256x256xbf16, #tpu.memory_space<vmem>>, %arg4: memref<1x256xf32, #tpu.memory_space<vmem>>, %arg5: memref<256x256xbf16, #tpu.memory_space<vmem>>, %arg6: memref<1x256xf32, #tpu.memory_space<vmem>>, %arg7: memref<256x256xbf16, #tpu.memory_space<vmem>>, %arg8: memref<1x256xf32, #tpu.memory_space<vmem>>, %arg9: memref<256x256xbf16, #tpu.memory_space<vmem>>, %arg10: memref<2x256xf32, #tpu.memory_space<vmem>>) attributes {dimension_semantics = [], scalar_prefetch = 0 : i64, scratch_operands = 0 : i64, tpu.core_type = #tpu.core_type<tc>} {
    %c0 = arith.constant 0 : index
    %c0_0 = arith.constant 0 : index
    %0 = vector.load %arg0[%c0, %c0_0] : memref<2x256xf32, #tpu.memory_space<vmem>>, vector<2x256xf32>
    %c0_1 = arith.constant 0 : index
    %c0_2 = arith.constant 0 : index
    %1 = vector.load %arg1[%c0_1, %c0_2] : memref<256x256xbf16, #tpu.memory_space<vmem>>, vector<256x256xbf16>
    %2 = arith.truncf %0 : vector<2x256xf32> to vector<2x256xbf16>
    %cst = arith.constant dense<0.000000e+00> : vector<2x256xf32>
    %3 = tpu.matmul %2, %1, %cst {dimension_numbers = #tpu.dot_dimension_numbers<[1], [0], [0], [1], [0, 0, 1, 1], [], []>} : vector<2x256xbf16>, vector<256x256xbf16>, vector<2x256xf32> -> vector<2x256xf32>
    %c0_3 = arith.constant 0 : index
    %c0_4 = arith.constant 0 : index
    %4 = vector.load %arg2[%c0_3, %c0_4] : memref<1x256xf32, #tpu.memory_space<vmem>>, vector<1x256xf32>
    %5 = vector.broadcast %4 : vector<1x256xf32> to vector<2x256xf32>
    %6 = arith.addf %3, %5 : vector<2x256xf32>
    %cst_5 = arith.constant 0.000000e+00 : f32
    %7 = vector.broadcast %cst_5 : f32 to vector<2x256xf32>
    %8 = arith.cmpf ogt, %6, %7 : vector<2x256xf32>
    %cst_6 = arith.constant 2.000000e-01 : f32
    %9 = vector.broadcast %cst_6 : f32 to vector<2x256xf32>
    %10 = arith.mulf %9, %6 : vector<2x256xf32>
    %11 = arith.select %8, %6, %10 : vector<2x256xi1>, vector<2x256xf32>
    %c0_7 = arith.constant 0 : index
    %c0_8 = arith.constant 0 : index
    %12 = vector.load %arg3[%c0_7, %c0_8] : memref<256x256xbf16, #tpu.memory_space<vmem>>, vector<256x256xbf16>
    %13 = arith.truncf %11 : vector<2x256xf32> to vector<2x256xbf16>
    %cst_9 = arith.constant dense<0.000000e+00> : vector<2x256xf32>
    %14 = tpu.matmul %13, %12, %cst_9 {dimension_numbers = #tpu.dot_dimension_numbers<[1], [0], [0], [1], [0, 0, 1, 1], [], []>} : vector<2x256xbf16>, vector<256x256xbf16>, vector<2x256xf32> -> vector<2x256xf32>
    %c0_10 = arith.constant 0 : index
    %c0_11 = arith.constant 0 : index
    %15 = vector.load %arg4[%c0_10, %c0_11] : memref<1x256xf32, #tpu.memory_space<vmem>>, vector<1x256xf32>
    %16 = vector.broadcast %15 : vector<1x256xf32> to vector<2x256xf32>
    %17 = arith.addf %14, %16 : vector<2x256xf32>
    %cst_12 = arith.constant 0.000000e+00 : f32
    %18 = vector.broadcast %cst_12 : f32 to vector<2x256xf32>
    %19 = arith.cmpf ogt, %17, %18 : vector<2x256xf32>
    %cst_13 = arith.constant 2.000000e-01 : f32
    %20 = vector.broadcast %cst_13 : f32 to vector<2x256xf32>
    %21 = arith.mulf %20, %17 : vector<2x256xf32>
    %22 = arith.select %19, %17, %21 : vector<2x256xi1>, vector<2x256xf32>
    %c0_14 = arith.constant 0 : index
    %c0_15 = arith.constant 0 : index
    %23 = vector.load %arg5[%c0_14, %c0_15] : memref<256x256xbf16, #tpu.memory_space<vmem>>, vector<256x256xbf16>
    %24 = arith.truncf %22 : vector<2x256xf32> to vector<2x256xbf16>
    %cst_16 = arith.constant dense<0.000000e+00> : vector<2x256xf32>
    %25 = tpu.matmul %24, %23, %cst_16 {dimension_numbers = #tpu.dot_dimension_numbers<[1], [0], [0], [1], [0, 0, 1, 1], [], []>} : vector<2x256xbf16>, vector<256x256xbf16>, vector<2x256xf32> -> vector<2x256xf32>
    %c0_17 = arith.constant 0 : index
    %c0_18 = arith.constant 0 : index
    %26 = vector.load %arg6[%c0_17, %c0_18] : memref<1x256xf32, #tpu.memory_space<vmem>>, vector<1x256xf32>
    %27 = vector.broadcast %26 : vector<1x256xf32> to vector<2x256xf32>
    %28 = arith.addf %25, %27 : vector<2x256xf32>
    %cst_19 = arith.constant 0.000000e+00 : f32
    %29 = vector.broadcast %cst_19 : f32 to vector<2x256xf32>
    %30 = arith.cmpf ogt, %28, %29 : vector<2x256xf32>
    %cst_20 = arith.constant 2.000000e-01 : f32
    %31 = vector.broadcast %cst_20 : f32 to vector<2x256xf32>
    %32 = arith.mulf %31, %28 : vector<2x256xf32>
    %33 = arith.select %30, %28, %32 : vector<2x256xi1>, vector<2x256xf32>
    %c0_21 = arith.constant 0 : index
    %c0_22 = arith.constant 0 : index
    %34 = vector.load %arg7[%c0_21, %c0_22] : memref<256x256xbf16, #tpu.memory_space<vmem>>, vector<256x256xbf16>
    %35 = arith.truncf %33 : vector<2x256xf32> to vector<2x256xbf16>
    %cst_23 = arith.constant dense<0.000000e+00> : vector<2x256xf32>
    %36 = tpu.matmul %35, %34, %cst_23 {dimension_numbers = #tpu.dot_dimension_numbers<[1], [0], [0], [1], [0, 0, 1, 1], [], []>} : vector<2x256xbf16>, vector<256x256xbf16>, vector<2x256xf32> -> vector<2x256xf32>
    %c0_24 = arith.constant 0 : index
    %c0_25 = arith.constant 0 : index
    %37 = vector.load %arg8[%c0_24, %c0_25] : memref<1x256xf32, #tpu.memory_space<vmem>>, vector<1x256xf32>
    %38 = vector.broadcast %37 : vector<1x256xf32> to vector<2x256xf32>
    %39 = arith.addf %36, %38 : vector<2x256xf32>
    %cst_26 = arith.constant 0.000000e+00 : f32
    %40 = vector.broadcast %cst_26 : f32 to vector<2x256xf32>
    %41 = arith.cmpf ogt, %39, %40 : vector<2x256xf32>
    %cst_27 = arith.constant 2.000000e-01 : f32
    %42 = vector.broadcast %cst_27 : f32 to vector<2x256xf32>
    %43 = arith.mulf %42, %39 : vector<2x256xf32>
    %44 = arith.select %41, %39, %43 : vector<2x256xi1>, vector<2x256xf32>
    %c0_28 = arith.constant 0 : index
    %c0_29 = arith.constant 0 : index
    %45 = vector.load %arg9[%c0_28, %c0_29] : memref<256x256xbf16, #tpu.memory_space<vmem>>, vector<256x256xbf16>
    %46 = arith.truncf %44 : vector<2x256xf32> to vector<2x256xbf16>
    %cst_30 = arith.constant dense<0.000000e+00> : vector<2x256xf32>
    %47 = tpu.matmul %46, %45, %cst_30 {dimension_numbers = #tpu.dot_dimension_numbers<[1], [0], [0], [1], [0, 0, 1, 1], [], []>} : vector<2x256xbf16>, vector<256x256xbf16>, vector<2x256xf32> -> vector<2x256xf32>
    %48 = arith.addf %47, %0 : vector<2x256xf32>
    %cst_31 = arith.constant 1.000000e+02 : f32
    %49 = vector.broadcast %cst_31 : f32 to vector<2x256xf32>
    %50 = arith.mulf %48, %49 : vector<2x256xf32>
    %51 = math.tanh %50 : vector<2x256xf32>
    %cst_32 = arith.constant 1.050000e+00 : f32
    %52 = vector.broadcast %cst_32 : f32 to vector<2x256xf32>
    %53 = arith.mulf %51, %52 : vector<2x256xf32>
    %c0_33 = arith.constant 0 : index
    %c0_34 = arith.constant 0 : index
    %54 = vector.load %arg10[%c0_33, %c0_34] : memref<2x256xf32, #tpu.memory_space<vmem>>, vector<2x256xf32>
    tpu.vector_store %arg10[%c0_33, %c0_34], %53 {strides = array<i32>} : memref<2x256xf32, #tpu.memory_space<vmem>>, vector<2x256xf32>,
    return
  }
}

</mosaic_0001>

<bundles_post_ra>
// kernel: generator_forward.1
= control target key start
LH: loop header
LB: loop body
LE: loop exit
PB: predicated region body
PF: predicated region fallthrough
CT: control target
= control target key end

     0   :  { %15 = vsyncpa [#allocation3], 0  ;;  %s2077_s0 = inlined_call_operand.hbm [shape: f32[2,256], index: 0, kind: input, shape index: {}]   ;;  %s2078_s1 = inlined_call_operand.hbm [shape: bf16[256,256], index: 1, kind: input, shape index: {}]   ;;  %s2079_s2 = inlined_call_operand.vmem [shape: f32[1,256], index: 2, kind: input, shape index: {}]   ;;  %s2080_s3 = inlined_call_operand.hbm [shape: bf16[256,256], index: 3, kind: input, shape index: {}]   ;;  %s2081_s4 = inlined_call_operand.vmem [shape: f32[1,256], index: 4, kind: input, shape index: {}]   ;;  %s2082_s5 = inlined_call_operand.hbm [shape: bf16[256,256], index: 5, kind: input, shape index: {}]   ;;  %s2083_s6 = inlined_call_operand.vmem [shape: f32[1,256], index: 6, kind: input, shape index: {}]   ;;  %s2084_s7 = inlined_call_operand.hbm [shape: bf16[256,256], index: 7, kind: input, shape index: {}]   ;;  %s2085_s8 = inlined_call_operand.vmem [shape: f32[1,256], index: 8, kind: input, shape index: {}]   ;;  %s2086_s9 = inlined_call_operand.hbm [shape: bf16[256,256], index: 9, kind: input, shape index: {}]   ;;  %s2087_s10 = inlined_call_operand.vmem [shape: f32[2,256], index: 10, kind: output, shape index: {}]  }
   0x1   :  { %16 = vsyncpa [#allocation5], 0 }
   0x2   :  { %17 = vsyncpa [#allocation8], 0 }
   0x3   :  { %18 = vsyncpa [#allocation11], 0  ;;  %s1942_s13 = smov [#allocation4]  }
   0x4   :  { %s34_s14 = sshll.u32 %s1942_s13, 4  ;;  %s35_s14 = int_to_ptr.vmem [resolvable:$true] %s34_s14 }
   0x5   :  { %s1822_s15 = scalar_lea.vmem %s35_s14, 4096  ;;  %p1827_p1 = scmp.lt.s32.totalorder %s35_s14, %s35_s14 }
   0x6   :  { %p1823_p0 = scmp.ne.s32.totalorder %s35_s14, %s1822_s15  ;;  %p1828_p2 = scmp.lt.s32.totalorder %s1822_s15, %s1822_s15 }
   0x8   :  { %p1829_p3 = por %p1828_p2, %p1827_p1 }
   0xa   :  { %p1830_p4 = pnand %p1829_p3, %p1823_p0 }
   0xc   :  { %1833 = shalt.err (!%p1830_p4)
}
   0xd   :  { %s1943_s16 = smov 128   ;;  %s1944_s17 = smov 8  }
   0xe   :  { %40 = dma.hbm_to_vmem [thread:$0]  %s2078_s1, 4096, %s35_s14, [#allocation5], %s1943_s16, %s1943_s16, %s1944_s17  }
   0xf   :  { %s1945_s20 = smov [#allocation7]   ;;  %s1946_s22 = smov [#allocation2]  }
  0x10   :  { %s62_s21 = sshll.u32 %s1945_s20, 4  ;;  %s25_s23 = sshll.u32 %s1946_s22, 4  ;;  %s63_s21 = int_to_ptr.vmem [resolvable:$true] %s62_s21  ;;  %s26_s23 = int_to_ptr.vmem [resolvable:$true] %s25_s23 }
  0x11   :  { %s1842_s24 = scalar_lea.vmem %s63_s21, 4096  ;;  %p1847_p6 = scmp.lt.s32.totalorder %s63_s21, %s63_s21 }
  0x12   :  { %p1843_p5 = scmp.ne.s32.totalorder %s63_s21, %s1842_s24  ;;  %p1848_p7 = scmp.lt.s32.totalorder %s1842_s24, %s1842_s24 }
  0x14   :  { %p1849_p8 = por %p1848_p7, %p1847_p6 }
  0x16   :  { %p1850_p9 = pnand %p1849_p8, %p1843_p5 }
  0x18   :  { %1853 = shalt.err (!%p1850_p9)
}
  0x19   :  { %68 = dma.hbm_to_vmem [thread:$0]  %s2082_s5, 4096, %s63_s21, [#allocation8], %s1943_s16, %s1943_s16, %s1944_s17  }
  0x1a   :  { %s1862_s1 = scalar_lea.vmem %s26_s23, 64  ;;  %p1867_p11 = scmp.lt.s32.totalorder %s26_s23, %s26_s23 }
  0x1b   :  { %p1863_p10 = scmp.ne.s32.totalorder %s26_s23, %s1862_s1  ;;  %p1868_p12 = scmp.lt.s32.totalorder %s1862_s1, %s1862_s1 }
  0x1d   :  { %p1869_p13 = por %p1868_p12, %p1867_p11 }
  0x1f   :  { %p1870_p0 = pnand %p1869_p13, %p1863_p10 }
  0x21   :  { %1873 = shalt.err (!%p1870_p0)
}
  0x22   :  { %28 = dma.hbm_to_vmem [thread:$0]  %s2077_s0, 64, %s26_s23, [#allocation3]  }
  0x23   :  { %s1947_s29 = smov [#allocation6]   ;;  %s1948_s11 = smov [#allocation9]  }
  0x24   :  { %s48_s30 = sshll.u32 %s1947_s29, 4  ;;  %s76_s12 = sshll.u32 %s1948_s11, 4  ;;  %s49_s30 = int_to_ptr.vmem [resolvable:$true] %s48_s30  ;;  %s77_s12 = int_to_ptr.vmem [resolvable:$true] %s76_s12 }
  0x25   :  { %s1882_s13 = scalar_lea.vmem %s49_s30, 4096  ;;  %p1887_p2 = scmp.lt.s32.totalorder %s49_s30, %s49_s30 }
  0x26   :  { %p1883_p1 = scmp.ne.s32.totalorder %s49_s30, %s1882_s13  ;;  %p1888_p3 = scmp.lt.s32.totalorder %s1882_s13, %s1882_s13 }
  0x28   :  { %p1889_p4 = por %p1888_p3, %p1887_p2 }
  0x2a   :  { %p1890_p5 = pnand %p1889_p4, %p1883_p1 }
  0x2c   :  { %1893 = shalt.err (!%p1890_p5)
}
  0x2d   :  { %54 = dma.hbm_to_vmem [thread:$0]  %s2080_s3, 4096, %s49_s30, [#allocation5], %s1943_s16, %s1943_s16, %s1944_s17  }
  0x2e   :  { %s1902_s0 = scalar_lea.vmem %s77_s12, 4096  ;;  %p1907_p7 = scmp.lt.s32.totalorder %s77_s12, %s77_s12 }
  0x2f   :  { %p1903_p6 = scmp.ne.s32.totalorder %s77_s12, %s1902_s0  ;;  %p1908_p8 = scmp.lt.s32.totalorder %s1902_s0, %s1902_s0 }
  0x31   :  { %p1909_p9 = por %p1908_p8, %p1907_p7 }
  0x33   :  { %p1910_p10 = pnand %p1909_p9, %p1903_p6 }
  0x35   :  { %1913 = shalt.err (!%p1910_p10)
}
  0x36   :  { %82 = dma.hbm_to_vmem [thread:$0]  %s2084_s7, 4096, %s77_s12, [#allocation8], %s1943_s16, %s1943_s16, %s1944_s17  }
  0x37   :  { %s1949_s19 = smov [#allocation10]  }
  0x38   :  { %s90_s20 = sshll.u32 %s1949_s19, 4  ;;  %s91_s20 = int_to_ptr.vmem [resolvable:$true] %s90_s20 }
  0x39   :  { %s1922_s21 = scalar_lea.vmem %s91_s20, 4096  ;;  %p1927_p12 = scmp.lt.s32.totalorder %s91_s20, %s91_s20 }
  0x3a   :  { %p1923_p11 = scmp.ne.s32.totalorder %s91_s20, %s1922_s21  ;;  %p1928_p13 = scmp.lt.s32.totalorder %s1922_s21, %s1922_s21 }
  0x3c   :  { %p1929_p0 = por %p1928_p13, %p1927_p12 }
  0x3e   :  { %p1930_p1 = pnand %p1929_p0, %p1923_p11 }
  0x40   :  { %1933 = shalt.err (!%p1930_p1)
}
  0x41   :  { %96 = dma.hbm_to_vmem [thread:$0]  %s2086_s9, 4096, %s91_s20, [#allocation11], %s1943_s16, %s1943_s16, %s1944_s17  }
  0x42   :  { %1934 = dma.done.wait [#allocation3], 64  }
  0x43   :  { %1935 = vsyncadd [#allocation3], 4294967232 }
  0x44   :  { %1936 = dma.done.wait [#allocation5], 8192  }
  0x45   :  { %1937 = vsyncadd [#allocation5], 4294959104 }
  0x46   :  { %1938 = dma.done.wait [#allocation8], 8192  }
  0x47   :  { %1939 = vsyncadd [#allocation8], 4294959104 }
  0x48   :  { %1940 = dma.done.wait [#allocation11], 4096  }
  0x49   :  { %1941 = vsyncadd [#allocation11], 4294963200  ;;  %v1570_v0 = vld [vmem:[#allocation4 + $0x74] ss:$8 sps:$4 sm:$0xff]   ;;  %v1572_v1 = vld [vmem:[#allocation4 + $0x70] ss:$8 sps:$4 sm:$0xff]  }
  0x4a   :  { %333 = vmatprep.subr.bf16.mxu0 %v1570_v0  ;;  %v1573_v2 = vld [vmem:[#allocation4 + $0x64] ss:$8 sps:$4 sm:$0xff]   ;;  %v1575_v3 = vld [vmem:[#allocation4 + $0x60] ss:$8 sps:$4 sm:$0xff]   ;;  %v1576_v4 = vld [vmem:[#allocation4 + $0x54] ss:$8 sps:$4 sm:$0xff]  }
  0x4b   :  { %334 = vmatpush1.bf16.msra.mxu0 %v1572_v1  ;;  %v1578_v5 = vld [vmem:[#allocation4 + $0x50] ss:$8 sps:$4 sm:$0xff]   ;;  %v1579_v6 = vld [vmem:[#allocation4 + $0x44] ss:$8 sps:$4 sm:$0xff]   ;;  %v1581_v7 = vld [vmem:[#allocation4 + $0x40] ss:$8 sps:$4 sm:$0xff]  }
  0x4c   :  { %335 = vmatprep.subr.bf16.mxu0 %v1573_v2  ;;  %v1582_v8 = vld [vmem:[#allocation4 + $0x34] ss:$8 sps:$4 sm:$0xff]   ;;  %v1584_v9 = vld [vmem:[#allocation4 + $0x30] ss:$8 sps:$4 sm:$0xff]   ;;  %v1585_v10 = vld [vmem:[#allocation4 + $0x24] ss:$8 sps:$4 sm:$0xff]  }
  0x4d   :  { %v1587_v11 = vld [vmem:[#allocation4 + $0x20] ss:$8 sps:$4 sm:$0xff]   ;;  %v1588_v12 = vld [vmem:[#allocation4 + $0x14] ss:$8 sps:$4 sm:$0xff]   ;;  %v1590_v13 = vld [vmem:[#allocation4 + $0x10] ss:$8 sps:$4 sm:$0xff]  }
  0x4e   :  { %v2038_v14 = vld.sshfl [vmem:[#allocation2] sm:$0x33 pattern:$0x76325410]  ;;  %v1620_v17 = vld [vmem:[#allocation6 + $0x70] ss:$8 sps:$4 sm:$0xff]  }
  0x4f   :  { %336 = vmatpush1.bf16.msra.mxu0 %v1575_v3  ;;  %v2042_v15 = vcombine.high %v2038_v14, %v2038_v14  ;;  %v1618_v16 = vld [vmem:[#allocation6 + $0x74] ss:$8 sps:$4 sm:$0xff]   ;;  %v1591_v18 = vld [vmem:[#allocation4 + $0x4] ss:$8 sps:$4 sm:$0xff]   ;;  %v1623_v21 = vld [vmem:[#allocation6 + $0x60] ss:$8 sps:$4 sm:$0xff]   ;;  %v159_v58 = vpack.c.bf16 %v2038_v14, %v2038_v14 }
  0x50   :  { %337 = vmatprep.subr.bf16.mxu0 %v1576_v4  ;;  %586 = vmatprep.subr.bf16.mxu1 %v1618_v16  ;;  %v1621_v20 = vld [vmem:[#allocation6 + $0x64] ss:$8 sps:$4 sm:$0xff]   ;;  %v1624_v22 = vld [vmem:[#allocation6 + $0x54] ss:$8 sps:$4 sm:$0xff]   ;;  %v1593_v23 = vld [vmem:[#allocation4] ss:$8 sps:$4 sm:$0xff]  }
  0x51   :  { %v160_v19 = vpack.c.bf16 %v2042_v15, %v2042_v15  ;;  %587 = vmatpush1.bf16.msra.mxu1 %v1620_v17  ;;  %v1594_v24 = vld [vmem:[#allocation4 + $0xf4] ss:$8 sps:$4 sm:$0xff]   ;;  %v1626_v25 = vld [vmem:[#allocation6 + $0x50] ss:$8 sps:$4 sm:$0xff]   ;;  %v1627_v26 = vld [vmem:[#allocation6 + $0x44] ss:$8 sps:$4 sm:$0xff]  }
  0x52   :  { %588 = vmatprep.subr.bf16.mxu1 %v1621_v20  ;;  %v1596_v27 = vld [vmem:[#allocation4 + $0xf0] ss:$8 sps:$4 sm:$0xff]   ;;  %v1597_v28 = vld [vmem:[#allocation4 + $0xe4] ss:$8 sps:$4 sm:$0xff]   ;;  %v1629_v29 = vld [vmem:[#allocation6 + $0x40] ss:$8 sps:$4 sm:$0xff]  }
  0x53   :  { %338 = vmatpush1.bf16.msra.mxu0 %v1578_v5  ;;  %365 = vmatprep.mubr.bf16.mxu0 %v160_v19  ;;  %v1630_v30 = vld [vmem:[#allocation6 + $0x34] ss:$8 sps:$4 sm:$0xff]   ;;  %v1599_v31 = vld [vmem:[#allocation4 + $0xe0] ss:$8 sps:$4 sm:$0xff]   ;;  %v1602_v33 = vld [vmem:[#allocation4 + $0xd0] ss:$8 sps:$4 sm:$0xff]  }
  0x54   :  { %339 = vmatprep.subr.bf16.mxu0 %v1579_v6  ;;  %v1600_v32 = vld [vmem:[#allocation4 + $0xd4] ss:$8 sps:$4 sm:$0xff]   ;;  %v1632_v34 = vld [vmem:[#allocation6 + $0x30] ss:$8 sps:$4 sm:$0xff]   ;;  %v1633_v35 = vld [vmem:[#allocation6 + $0x24] ss:$8 sps:$4 sm:$0xff]  }
  0x55   :  { %589 = vmatpush1.bf16.msra.mxu1 %v1623_v21  ;;  %v1603_v36 = vld [vmem:[#allocation4 + $0xc4] ss:$8 sps:$4 sm:$0xff]   ;;  %v1635_v37 = vld [vmem:[#allocation6 + $0x20] ss:$8 sps:$4 sm:$0xff]   ;;  %v1636_v38 = vld [vmem:[#allocation6 + $0x14] ss:$8 sps:$4 sm:$0xff]  }
  0x56   :  { %590 = vmatprep.subr.bf16.mxu1 %v1624_v22  ;;  %v1605_v39 = vld [vmem:[#allocation4 + $0xc0] ss:$8 sps:$4 sm:$0xff]   ;;  %v1606_v40 = vld [vmem:[#allocation4 + $0xb4] ss:$8 sps:$4 sm:$0xff]   ;;  %v1638_v41 = vld [vmem:[#allocation6 + $0x10] ss:$8 sps:$4 sm:$0xff]  }
  0x57   :  { %340 = vmatpush1.bf16.msra.mxu0 %v1581_v7  ;;  %v1639_v42 = vld [vmem:[#allocation6 + $0x4] ss:$8 sps:$4 sm:$0xff]   ;;  %v1608_v43 = vld [vmem:[#allocation4 + $0xb0] ss:$8 sps:$4 sm:$0xff]   ;;  %v1641_v45 = vld [vmem:[#allocation6] ss:$8 sps:$4 sm:$0xff]  }
  0x58   :  { %341 = vmatprep.subr.bf16.mxu0 %v1582_v8  ;;  %v1609_v44 = vld [vmem:[#allocation4 + $0xa4] ss:$8 sps:$4 sm:$0xff]   ;;  %v1642_v46 = vld [vmem:[#allocation6 + $0xf4] ss:$8 sps:$4 sm:$0xff]   ;;  %v1611_v47 = vld [vmem:[#allocation4 + $0xa0] ss:$8 sps:$4 sm:$0xff]  }
  0x59   :  { %591 = vmatpush1.bf16.msra.mxu1 %v1626_v25  ;;  %v1612_v48 = vld [vmem:[#allocation4 + $0x94] ss:$8 sps:$4 sm:$0xff]   ;;  %v1644_v49 = vld [vmem:[#allocation6 + $0xf0] ss:$8 sps:$4 sm:$0xff]   ;;  %v1645_v50 = vld [vmem:[#allocation6 + $0xe4] ss:$8 sps:$4 sm:$0xff]  }
  0x5a   :  { %592 = vmatprep.subr.bf16.mxu1 %v1627_v26  ;;  %v1614_v51 = vld [vmem:[#allocation4 + $0x90] ss:$8 sps:$4 sm:$0xff]   ;;  %v1615_v52 = vld [vmem:[#allocation4 + $0x84] ss:$8 sps:$4 sm:$0xff]   ;;  %v1647_v53 = vld [vmem:[#allocation6 + $0xe0] ss:$8 sps:$4 sm:$0xff]  }
  0x5b   :  { %342 = vmatpush1.bf16.msra.mxu0 %v1584_v9  ;;  %v1648_v54 = vld [vmem:[#allocation6 + $0xd4] ss:$8 sps:$4 sm:$0xff]   ;;  %v1617_v55 = vld [vmem:[#allocation4 + $0x80] ss:$8 sps:$4 sm:$0xff]   ;;  %v1650_v56 = vld [vmem:[#allocation6 + $0xd0] ss:$8 sps:$4 sm:$0xff]  }
  0x5c   :  { %343 = vmatprep.subr.bf16.mxu0 %v1585_v10  ;;  %v1651_v57 = vld [vmem:[#allocation6 + $0xc4] ss:$8 sps:$4 sm:$0xff]   ;;  %v1653_v59 = vld [vmem:[#allocation6 + $0xc0] ss:$8 sps:$4 sm:$0xff]   ;;  %v1654_v60 = vld [vmem:[#allocation6 + $0xb4] ss:$8 sps:$4 sm:$0xff]  }
  0x5d   :  { %593 = vmatpush1.bf16.msra.mxu1 %v1629_v29  ;;  %v1656_v61 = vld [vmem:[#allocation6 + $0xb0] ss:$8 sps:$4 sm:$0xff]   ;;  %v1657_v62 = vld [vmem:[#allocation6 + $0xa4] ss:$8 sps:$4 sm:$0xff]   ;;  %v1659_v63 = vld [vmem:[#allocation6 + $0xa0] ss:$8 sps:$4 sm:$0xff]  }
  0x5e   :  { %594 = vmatprep.subr.bf16.mxu1 %v1630_v30  ;;  %v1660_v0 = vld [vmem:[#allocation6 + $0x94] ss:$8 sps:$4 sm:$0xff]   ;;  %v1662_v1 = vld [vmem:[#allocation6 + $0x90] ss:$8 sps:$4 sm:$0xff]   ;;  %v1663_v2 = vld [vmem:[#allocation6 + $0x84] ss:$8 sps:$4 sm:$0xff]  }
  0x5f   :  { %344 = vmatpush1.bf16.msra.mxu0 %v1587_v11  ;;  %v1665_v3 = vld [vmem:[#allocation6 + $0x80] ss:$8 sps:$4 sm:$0xff]   ;;  %v1666_v4 = vld [vmem:[#allocation7 + $0x70] ss:$8 sps:$4 sm:$0xff]   ;;  %v1668_v5 = vld [vmem:[#allocation7 + $0x74] ss:$8 sps:$4 sm:$0xff]  }
  0x60   :  { %345 = vmatprep.subr.bf16.mxu0 %v1588_v12  ;;  %v1671_v6 = vld [vmem:[#allocation7 + $0x64] ss:$8 sps:$4 sm:$0xff]   ;;  %v1669_v7 = vld [vmem:[#allocation7 + $0x60] ss:$8 sps:$4 sm:$0xff]   ;;  %v1674_v8 = vld [vmem:[#allocation7 + $0x54] ss:$8 sps:$4 sm:$0xff]  }
  0x61   :  { %595 = vmatpush1.bf16.msra.mxu1 %v1632_v34  ;;  %v1672_v9 = vld [vmem:[#allocation7 + $0x50] ss:$8 sps:$4 sm:$0xff]   ;;  %v1677_v10 = vld [vmem:[#allocation7 + $0x44] ss:$8 sps:$4 sm:$0xff]   ;;  %v1675_v11 = vld [vmem:[#allocation7 + $0x40] ss:$8 sps:$4 sm:$0xff]   ;;  %v163_v34 = vlaneseq }
  0x62   :  { %596 = vmatprep.subr.bf16.mxu1 %v1633_v35  ;;  %v1680_v12 = vld [vmem:[#allocation7 + $0x34] ss:$8 sps:$4 sm:$0xff]   ;;  %v1683_v16 = vld [vmem:[#allocation7 + $0x24] ss:$8 sps:$4 sm:$0xff]   ;;  %v1681_v17 = vld [vmem:[#allocation7 + $0x20] ss:$8 sps:$4 sm:$0xff]  }
  0x63   :  { %346 = vmatpush1.bf16.msra.mxu0 %v1590_v13  ;;  %v1678_v13 = vld [vmem:[#allocation7 + $0x30] ss:$8 sps:$4 sm:$0xff]   ;;  %v1689_v20 = vld [vmem:[#allocation7 + $0x4] ss:$8 sps:$4 sm:$0xff]   ;;  %v1687_v21 = vld [vmem:[#allocation7] ss:$8 sps:$4 sm:$0xff]  }
  0x64   :  { %347 = vmatprep.subr.bf16.mxu0 %v1591_v18  ;;  %v1686_v18 = vld [vmem:[#allocation7 + $0x14] ss:$8 sps:$4 sm:$0xff]   ;;  %v1684_v19 = vld [vmem:[#allocation7 + $0x10] ss:$8 sps:$4 sm:$0xff]   ;;  %v1693_v25 = vld [vmem:[#allocation7 + $0xe0] ss:$8 sps:$4 sm:$0xff]  }
  0x65   :  { %597 = vmatpush1.bf16.msra.mxu1 %v1635_v37  ;;  %v1692_v22 = vld [vmem:[#allocation7 + $0xf4] ss:$8 sps:$4 sm:$0xff]   ;;  %v1699_v29 = vld [vmem:[#allocation7 + $0xc0] ss:$8 sps:$4 sm:$0xff]   ;;  %v164_v35 = vshrl.u32 %v163_v34, 7 }
  0x66   :  { %598 = vmatprep.subr.bf16.mxu1 %v1636_v38  ;;  %v1698_v26 = vld [vmem:[#allocation7 + $0xd4] ss:$8 sps:$4 sm:$0xff]  }
  0x67   :  { %348 = vmatpush1.bf16.msra.mxu0 %v1593_v23  ;;  %v1690_v23 = vld [vmem:[#allocation7 + $0xf0] ss:$8 sps:$4 sm:$0xff]   ;;  %v1704_v30 = vld [vmem:[#allocation7 + $0xb4] ss:$8 sps:$4 sm:$0xff]   ;;  %v2053_v38 = vsub.s32 1, %v164_v35 }
  0x68   :  { %349 = vmatprep.subr.bf16.mxu0 %v1594_v24  ;;  %v1695_v24 = vld [vmem:[#allocation7 + $0xe4] ss:$8 sps:$4 sm:$0xff]   ;;  %v161_v37 = vld [vmem:[%s2079_s2] sm:$0x3] }
  0x69   :  { %599 = vmatpush1.bf16.msra.mxu1 %v1638_v41 }
  0x6a   :  { %600 = vmatprep.subr.bf16.mxu1 %v1639_v42 }
  0x6b   :  { %350 = vmatpush2.bf16.msra.mxu0 %v1596_v27  ;;  %v1696_v27 = vld [vmem:[#allocation7 + $0xd0] ss:$8 sps:$4 sm:$0xff]  }
  0x6c   :  { %351 = vmatprep.subr.bf16.mxu0 %v1597_v28  ;;  %v1701_v28 = vld [vmem:[#allocation7 + $0xc4] ss:$8 sps:$4 sm:$0xff]  }
  0x6d   :  { %601 = vmatpush1.bf16.msra.mxu1 %v1641_v45 }
  0x6e   :  { %602 = vmatprep.subr.bf16.mxu1 %v1642_v46 }
  0x6f   :  { %352 = vmatpush2.bf16.msra.mxu0 %v1599_v31  ;;  %v1702_v31 = vld [vmem:[#allocation7 + $0xb0] ss:$8 sps:$4 sm:$0xff]  }
  0x70   :  { %353 = vmatprep.subr.bf16.mxu0 %v1600_v32  ;;  %v1707_v32 = vld [vmem:[#allocation7 + $0xa4] ss:$8 sps:$4 sm:$0xff]  }
  0x71   :  { %603 = vmatpush2.bf16.msra.mxu1 %v1644_v49 }
  0x72   :  { %604 = vmatprep.subr.bf16.mxu1 %v1645_v50 }
  0x73   :  { %354 = vmatpush2.bf16.msra.mxu0 %v1602_v33  ;;  %v1705_v33 = vld [vmem:[#allocation7 + $0xa0] ss:$8 sps:$4 sm:$0xff]  }
  0x74   :  { %355 = vmatprep.subr.bf16.mxu0 %v1603_v36  ;;  %v2048_v36 = vsub.s32 0, %v164_v35 }
  0x75   :  { %605 = vmatpush2.bf16.msra.mxu1 %v1647_v53  ;;  %v1710_v53 = vld [vmem:[#allocation7 + $0x94] ss:$8 sps:$4 sm:$0xff]  }
  0x76   :  { %606 = vmatprep.subr.bf16.mxu1 %v1648_v54  ;;  %v1708_v54 = vld [vmem:[#allocation7 + $0x90] ss:$8 sps:$4 sm:$0xff]  }
  0x77   :  { %356 = vmatpush2.bf16.msra.mxu0 %v1605_v39  ;;  %v166_v39 = vrot.slane %v161_v37, %v2048_v36 }
  0x78   :  { %357 = vmatprep.subr.bf16.mxu0 %v1606_v40  ;;  %v170_v40 = vrot.slane %v161_v37, %v2053_v38 }
  0x79   :  { %607 = vmatpush2.bf16.msra.mxu1 %v1650_v56  ;;  %v1711_v56 = vld [vmem:[#allocation7 + $0x80] ss:$8 sps:$4 sm:$0xff]  }
  0x7a   :  { %608 = vmatprep.subr.bf16.mxu1 %v1651_v57  ;;  %v1714_v57 = vld [vmem:[#allocation9 + $0x70] ss:$8 sps:$4 sm:$0xff]  }
  0x7b   :  { %358 = vmatpush2.bf16.msra.mxu0 %v1608_v43 }
  0x7c   :  { %359 = vmatprep.subr.bf16.mxu0 %v1609_v44 }
  0x7d   :  { %609 = vmatpush2.bf16.msra.mxu1 %v1653_v59  ;;  %v1719_v59 = vld [vmem:[#allocation9 + $0x64] ss:$8 sps:$4 sm:$0xff]  }
  0x7e   :  { %610 = vmatprep.subr.bf16.mxu1 %v1654_v60  ;;  %v1717_v60 = vld [vmem:[#allocation9 + $0x60] ss:$8 sps:$4 sm:$0xff]  }
  0x7f   :  { %360 = vmatpush2.bf16.msra.mxu0 %v1611_v47 }
  0x80   :  { %361 = vmatprep.subr.bf16.mxu0 %v1612_v48 }
  0x81   :  { %611 = vmatpush2.bf16.msra.mxu1 %v1656_v61  ;;  %v1722_v61 = vld [vmem:[#allocation9 + $0x54] ss:$8 sps:$4 sm:$0xff]  }
  0x82   :  { %612 = vmatprep.subr.bf16.mxu1 %v1657_v62  ;;  %v1720_v62 = vld [vmem:[#allocation9 + $0x50] ss:$8 sps:$4 sm:$0xff]  }
  0x83   :  { %362 = vmatpush2.bf16.msra.mxu0 %v1614_v51 }
  0x84   :  { %363 = vmatprep.subr.bf16.mxu0 %v1615_v52 }
  0x85   :  { %613 = vmatpush2.bf16.msra.mxu1 %v1659_v63  ;;  %v1725_v63 = vld [vmem:[#allocation9 + $0x44] ss:$8 sps:$4 sm:$0xff]  }
  0x86   :  { %614 = vmatprep.subr.bf16.mxu1 %v1660_v0  ;;  %v1723_v0 = vld [vmem:[#allocation9 + $0x40] ss:$8 sps:$4 sm:$0xff]  }
  0x87   :  { %364 = vmatpush2.bf16.msra.mxu0 %v1617_v55  ;;  %v1713_v55 = vld [vmem:[#allocation7 + $0x84] ss:$8 sps:$4 sm:$0xff]  }
  0x88   :  { %839 = vmatprep.subr.bf16.mxu0 %v1668_v5  ;;  %v1734_v5 = vld [vmem:[#allocation9 + $0x14] ss:$8 sps:$4 sm:$0xff]  }
  0x89   :  { %615 = vmatpush2.bf16.msra.mxu1 %v1662_v1  ;;  %v1728_v1 = vld [vmem:[#allocation9 + $0x34] ss:$8 sps:$4 sm:$0xff]  }
  0x8a   :  { %366 = vmatmul.mubr.bf16.vlgmr.msra.gmra.mxu0 %v159_v58  ;;  %616 = vmatprep.subr.bf16.mxu1 %v1663_v2  ;;  %v1716_v58 = vld [vmem:[#allocation9 + $0x74] ss:$8 sps:$4 sm:$0xff]   ;;  %v1726_v2 = vld [vmem:[#allocation9 + $0x30] ss:$8 sps:$4 sm:$0xff]  }
  0x8b   :  { %840 = vmatpush1.bf16.msra.mxu0 %v1666_v4  ;;  %v1729_v4 = vld [vmem:[#allocation9 + $0x20] ss:$8 sps:$4 sm:$0xff]  }
  0x8c   :  { %841 = vmatprep.subr.bf16.mxu0 %v1671_v6  ;;  %v1732_v6 = vld [vmem:[#allocation9 + $0x10] ss:$8 sps:$4 sm:$0xff]  }
  0x8d   :  { %617 = vmatpush2.bf16.msra.mxu1 %v1665_v3  ;;  %v1731_v3 = vld [vmem:[#allocation9 + $0x24] ss:$8 sps:$4 sm:$0xff]  }
  0x8e   :  { %1092 = vmatprep.subr.bf16.mxu1 %v1716_v58  ;;  %v1785_v58 = vld [vmem:[#allocation10 + $0x4] ss:$8 sps:$4 sm:$0xff]  }
  0x8f   :  { %842 = vmatpush1.bf16.msra.mxu0 %v1669_v7  ;;  %v1737_v7 = vld [vmem:[#allocation9 + $0x4] ss:$8 sps:$4 sm:$0xff]  }
  0x90   :  { %843 = vmatprep.subr.bf16.mxu0 %v1674_v8  ;;  %v1735_v8 = vld [vmem:[#allocation9] ss:$8 sps:$4 sm:$0xff]  }
  0x93   :  { %844 = vmatpush1.bf16.msra.mxu0 %v1672_v9  ;;  %v1740_v9 = vld [vmem:[#allocation9 + $0xf4] ss:$8 sps:$4 sm:$0xff]  }
  0x94   :  { %845 = vmatprep.subr.bf16.mxu0 %v1677_v10  ;;  %v1738_v10 = vld [vmem:[#allocation9 + $0xf0] ss:$8 sps:$4 sm:$0xff]  }
  0x97   :  { %846 = vmatpush1.bf16.msra.mxu0 %v1675_v11  ;;  %v1743_v11 = vld [vmem:[#allocation9 + $0xe4] ss:$8 sps:$4 sm:$0xff]  }
  0x98   :  { %847 = vmatprep.subr.bf16.mxu0 %v1680_v12  ;;  %v1741_v12 = vld [vmem:[#allocation9 + $0xe0] ss:$8 sps:$4 sm:$0xff]  }
  0x9b   :  { %848 = vmatpush1.bf16.msra.mxu0 %v1678_v13  ;;  %v1746_v13 = vld [vmem:[#allocation9 + $0xd4] ss:$8 sps:$4 sm:$0xff]  }
  0x9c   :  { %849 = vmatprep.subr.bf16.mxu0 %v1683_v16  ;;  %v1744_v16 = vld [vmem:[#allocation9 + $0xd0] ss:$8 sps:$4 sm:$0xff]  }
  0x9f   :  { %850 = vmatpush1.bf16.msra.mxu0 %v1681_v17  ;;  %v1749_v17 = vld [vmem:[#allocation9 + $0xc4] ss:$8 sps:$4 sm:$0xff]  }
  0xa0   :  { %851 = vmatprep.subr.bf16.mxu0 %v1686_v18  ;;  %v1747_v18 = vld [vmem:[#allocation9 + $0xc0] ss:$8 sps:$4 sm:$0xff]  }
  0xa3   :  { %852 = vmatpush1.bf16.msra.mxu0 %v1684_v19  ;;  %v1752_v19 = vld [vmem:[#allocation9 + $0xb4] ss:$8 sps:$4 sm:$0xff]  }
  0xa4   :  { %853 = vmatprep.subr.bf16.mxu0 %v1689_v20  ;;  %v1750_v20 = vld [vmem:[#allocation9 + $0xb0] ss:$8 sps:$4 sm:$0xff]  }
  0xa7   :  { %854 = vmatpush1.bf16.msra.mxu0 %v1687_v21  ;;  %v1755_v21 = vld [vmem:[#allocation9 + $0xa4] ss:$8 sps:$4 sm:$0xff]  }
  0xa8   :  { %855 = vmatprep.subr.bf16.mxu0 %v1692_v22  ;;  %v1753_v22 = vld [vmem:[#allocation9 + $0xa0] ss:$8 sps:$4 sm:$0xff]  }
  0xab   :  { %856 = vmatpush2.bf16.msra.mxu0 %v1690_v23  ;;  %v414_v23 = vld [vmem:[%s2081_s4] sm:$0x3] }
  0xac   :  { %857 = vmatprep.subr.bf16.mxu0 %v1695_v24  ;;  %v419_v24 = vrot.slane %v414_v23, %v2048_v36 }
  0xaf   :  { %858 = vmatpush2.bf16.msra.mxu0 %v1693_v25  ;;  %v423_v25 = vrot.slane %v414_v23, %v2053_v38 }
  0xb0   :  { %859 = vmatprep.subr.bf16.mxu0 %v1698_v26 }
  0xb3   :  { %860 = vmatpush2.bf16.msra.mxu0 %v1696_v27 }
  0xb4   :  { %861 = vmatprep.subr.bf16.mxu0 %v1701_v28 }
  0xb7   :  { %862 = vmatpush2.bf16.msra.mxu0 %v1699_v29 }
  0xb8   :  { %863 = vmatprep.subr.bf16.mxu0 %v1704_v30 }
  0xbb   :  { %864 = vmatpush2.bf16.msra.mxu0 %v1702_v31 }
  0xbc   :  { %865 = vmatprep.subr.bf16.mxu0 %v1707_v32 }
  0xbf   :  { %866 = vmatpush2.bf16.msra.mxu0 %v1705_v33 }
  0xc0   :  { %867 = vmatprep.subr.bf16.mxu0 %v1710_v53  ;;  %v1774_v53 = vld [vmem:[#allocation10 + $0x30] ss:$8 sps:$4 sm:$0xff]  }
  0xc3   :  { %868 = vmatpush2.bf16.msra.mxu0 %v1708_v54  ;;  %v1779_v54 = vld [vmem:[#allocation10 + $0x24] ss:$8 sps:$4 sm:$0xff]  }
  0xc4   :  { %869 = vmatprep.subr.bf16.mxu0 %v1713_v55  ;;  %v1777_v55 = vld [vmem:[#allocation10 + $0x20] ss:$8 sps:$4 sm:$0xff]  }
  0xc7   :  { %870 = vmatpush2.bf16.msra.mxu0 %v1711_v56  ;;  %v1782_v56 = vld [vmem:[#allocation10 + $0x14] ss:$8 sps:$4 sm:$0xff]  }
 0x14a   :  { %v367_v41 = vpop.f32.mrf.mxu0 }
 0x14b   :  { %v368_v42 = vadd.f32 %v367_v41, %v166_v39  ;;  %v1756_v41 = vld [vmem:[#allocation9 + $0x90] ss:$8 sps:$4 sm:$0xff]  }
 0x14c   :  { %v369_v43 = vpop.f32.mrf.mxu0 }
 0x14d   :  { %vm374_vm0 = vcmp.gt.f32.partialorder %v368_v42, 0.0  ;;  %v376_v44 = vmul.f32 0.2, %v368_v42  ;;  %v370_v45 = vadd.f32 %v369_v43, %v170_v40  ;;  %v1758_v40 = vld [vmem:[#allocation9 + $0x94] ss:$8 sps:$4 sm:$0xff]  }
 0x14e   :  { %v371_v46 = vpop.f32.mrf.mxu0  ;;  %v1759_v43 = vld [vmem:[#allocation9 + $0x80] ss:$8 sps:$4 sm:$0xff]  }
 0x14f   :  { %vm375_vm1 = vcmp.gt.f32.partialorder %v370_v45, 0.0  ;;  %v377_v47 = vmul.f32 0.2, %v370_v45  ;;  %v378_v49 = vsel %vm374_vm0, %v368_v42, %v376_v44  ;;  %v1761_v42 = vld [vmem:[#allocation9 + $0x84] ss:$8 sps:$4 sm:$0xff]  }
 0x150   :  { %v372_v48 = vpop.f32.mrf.mxu0  ;;  %v412_v52 = vpack.c.bf16 %v378_v49, %v378_v49  ;;  %v1762_v44 = vld [vmem:[#allocation10 + $0x70] ss:$8 sps:$4 sm:$0xff]   ;;  %v1767_v46 = vld [vmem:[#allocation10 + $0x64] ss:$8 sps:$4 sm:$0xff]  }
 0x151   :  { %v379_v50 = vsel %vm375_vm1, %v370_v45, %v377_v47  ;;  %v1764_v45 = vld [vmem:[#allocation10 + $0x74] ss:$8 sps:$4 sm:$0xff]   ;;  %v1765_v47 = vld [vmem:[#allocation10 + $0x60] ss:$8 sps:$4 sm:$0xff]   ;;  %v1768_v49 = vld [vmem:[#allocation10 + $0x50] ss:$8 sps:$4 sm:$0xff]  }
 0x152   :  { %v413_v51 = vpack.c.bf16 %v379_v50, %v379_v50  ;;  %1333 = vmatprep.subr.bf16.mxu0 %v1764_v45  ;;  %v1770_v48 = vld [vmem:[#allocation10 + $0x54] ss:$8 sps:$4 sm:$0xff]   ;;  %v1773_v50 = vld [vmem:[#allocation10 + $0x44] ss:$8 sps:$4 sm:$0xff]  }
 0x154   :  { %618 = vmatprep.mubr.bf16.mxu1 %v413_v51  ;;  %v1771_v51 = vld [vmem:[#allocation10 + $0x40] ss:$8 sps:$4 sm:$0xff]  }
 0x155   :  { %619 = vmatmul.mubr.bf16.vlgmr.msra.gmra.mxu1 %v412_v52  ;;  %v1776_v52 = vld [vmem:[#allocation10 + $0x34] ss:$8 sps:$4 sm:$0xff]  }
 0x156   :  { %1093 = vmatpush1.bf16.msra.mxu1 %v1714_v57  ;;  %v1780_v57 = vld [vmem:[#allocation10 + $0x10] ss:$8 sps:$4 sm:$0xff]  }
 0x157   :  { %1094 = vmatprep.subr.bf16.mxu1 %v1719_v59  ;;  %v1783_v59 = vld [vmem:[#allocation10] ss:$8 sps:$4 sm:$0xff]  }
 0x15a   :  { %1095 = vmatpush1.bf16.msra.mxu1 %v1717_v60  ;;  %v1788_v60 = vld [vmem:[#allocation10 + $0xf4] ss:$8 sps:$4 sm:$0xff]  }
 0x15b   :  { %1096 = vmatprep.subr.bf16.mxu1 %v1722_v61  ;;  %v1786_v61 = vld [vmem:[#allocation10 + $0xf0] ss:$8 sps:$4 sm:$0xff]  }
 0x15e   :  { %1097 = vmatpush1.bf16.msra.mxu1 %v1720_v62  ;;  %v1791_v62 = vld [vmem:[#allocation10 + $0xe4] ss:$8 sps:$4 sm:$0xff]  }
 0x15f   :  { %1098 = vmatprep.subr.bf16.mxu1 %v1725_v63  ;;  %v1789_v63 = vld [vmem:[#allocation10 + $0xe0] ss:$8 sps:$4 sm:$0xff]  }
 0x162   :  { %1099 = vmatpush1.bf16.msra.mxu1 %v1723_v0  ;;  %v1794_v0 = vld [vmem:[#allocation10 + $0xd4] ss:$8 sps:$4 sm:$0xff]  }
 0x163   :  { %1100 = vmatprep.subr.bf16.mxu1 %v1728_v1  ;;  %v1792_v1 = vld [vmem:[#allocation10 + $0xd0] ss:$8 sps:$4 sm:$0xff]  }
 0x166   :  { %1101 = vmatpush1.bf16.msra.mxu1 %v1726_v2  ;;  %v1797_v2 = vld [vmem:[#allocation10 + $0xc4] ss:$8 sps:$4 sm:$0xff]  }
 0x167   :  { %1102 = vmatprep.subr.bf16.mxu1 %v1731_v3  ;;  %v1795_v3 = vld [vmem:[#allocation10 + $0xc0] ss:$8 sps:$4 sm:$0xff]  }
 0x16a   :  { %1103 = vmatpush1.bf16.msra.mxu1 %v1729_v4  ;;  %v1800_v4 = vld [vmem:[#allocation10 + $0xb4] ss:$8 sps:$4 sm:$0xff]  }
 0x16b   :  { %1104 = vmatprep.subr.bf16.mxu1 %v1734_v5  ;;  %v1798_v5 = vld [vmem:[#allocation10 + $0xb0] ss:$8 sps:$4 sm:$0xff]  }
 0x16e   :  { %1105 = vmatpush1.bf16.msra.mxu1 %v1732_v6  ;;  %v1803_v6 = vld [vmem:[#allocation10 + $0xa4] ss:$8 sps:$4 sm:$0xff]  }
 0x16f   :  { %1106 = vmatprep.subr.bf16.mxu1 %v1737_v7  ;;  %v1801_v7 = vld [vmem:[#allocation10 + $0xa0] ss:$8 sps:$4 sm:$0xff]  }
 0x172   :  { %1107 = vmatpush1.bf16.msra.mxu1 %v1735_v8  ;;  %v667_v8 = vld [vmem:[%s2083_s6] sm:$0x3] }
 0x173   :  { %1108 = vmatprep.subr.bf16.mxu1 %v1740_v9  ;;  %v672_v9 = vrot.slane %v667_v8, %v2048_v36 }
 0x176   :  { %1109 = vmatpush2.bf16.msra.mxu1 %v1738_v10  ;;  %v676_v10 = vrot.slane %v667_v8, %v2053_v38 }
 0x177   :  { %1110 = vmatprep.subr.bf16.mxu1 %v1743_v11 }
 0x17a   :  { %1111 = vmatpush2.bf16.msra.mxu1 %v1741_v12 }
 0x17b   :  { %1112 = vmatprep.subr.bf16.mxu1 %v1746_v13 }
 0x17e   :  { %1113 = vmatpush2.bf16.msra.mxu1 %v1744_v16 }
 0x17f   :  { %1114 = vmatprep.subr.bf16.mxu1 %v1749_v17 }
 0x182   :  { %1115 = vmatpush2.bf16.msra.mxu1 %v1747_v18 }
 0x183   :  { %1116 = vmatprep.subr.bf16.mxu1 %v1752_v19 }
 0x186   :  { %1117 = vmatpush2.bf16.msra.mxu1 %v1750_v20 }
 0x187   :  { %1118 = vmatprep.subr.bf16.mxu1 %v1755_v21 }
 0x18a   :  { %1119 = vmatpush2.bf16.msra.mxu1 %v1753_v22 }
 0x18b   :  { %1120 = vmatprep.subr.bf16.mxu1 %v1758_v40 }
 0x18e   :  { %1121 = vmatpush2.bf16.msra.mxu1 %v1756_v41 }
 0x18f   :  { %1122 = vmatprep.subr.bf16.mxu1 %v1761_v42 }
 0x192   :  { %1123 = vmatpush2.bf16.msra.mxu1 %v1759_v43 }
 0x215   :  { %v620_v26 = vpop.f32.mrf.mxu1 }
 0x216   :  { %v621_v27 = vadd.f32 %v620_v26, %v419_v24  ;;  %v1804_v26 = vld [vmem:[#allocation10 + $0x90] ss:$8 sps:$4 sm:$0xff]  }
 0x217   :  { %v622_v28 = vpop.f32.mrf.mxu1 }
 0x218   :  { %vm627_vm2 = vcmp.gt.f32.partialorder %v621_v27, 0.0  ;;  %v629_v29 = vmul.f32 0.2, %v621_v27  ;;  %v623_v30 = vadd.f32 %v622_v28, %v423_v25  ;;  %v1806_v25 = vld [vmem:[#allocation10 + $0x94] ss:$8 sps:$4 sm:$0xff]  }
 0x219   :  { %v624_v31 = vpop.f32.mrf.mxu1  ;;  %v1807_v28 = vld [vmem:[#allocation10 + $0x80] ss:$8 sps:$4 sm:$0xff]  }
 0x21a   :  { %vm628_vm3 = vcmp.gt.f32.partialorder %v623_v30, 0.0  ;;  %v630_v32 = vmul.f32 0.2, %v623_v30  ;;  %v631_v33 = vsel %vm627_vm2, %v621_v27, %v629_v29  ;;  %v1809_v27 = vld [vmem:[#allocation10 + $0x84] ss:$8 sps:$4 sm:$0xff]  }
 0x21b   :  { %v625_v34 = vpop.f32.mrf.mxu1  ;;  %v665_v39 = vpack.c.bf16 %v631_v33, %v631_v33  ;;  %v920_v29 = vld [vmem:[%s2085_s8] sm:$0x3] }
 0x21c   :  { %v632_v35 = vsel %vm628_vm3, %v623_v30, %v630_v32  ;;  %v925_v30 = vrot.slane %v920_v29, %v2048_v36  ;;  %v929_v31 = vrot.slane %v920_v29, %v2053_v38 }
 0x21d   :  { %v666_v37 = vpack.c.bf16 %v632_v35, %v632_v35 }
 0x21f   :  { %871 = vmatprep.mubr.bf16.mxu0 %v666_v37 }
 0x220   :  { %872 = vmatmul.mubr.bf16.vlgmr.msra.gmra.mxu0 %v665_v39 }
 0x221   :  { %1334 = vmatpush1.bf16.msra.mxu0 %v1762_v44 }
 0x222   :  { %1335 = vmatprep.subr.bf16.mxu0 %v1767_v46 }
 0x225   :  { %1336 = vmatpush1.bf16.msra.mxu0 %v1765_v47 }
 0x226   :  { %1337 = vmatprep.subr.bf16.mxu0 %v1770_v48 }
 0x229   :  { %1338 = vmatpush1.bf16.msra.mxu0 %v1768_v49 }
 0x22a   :  { %1339 = vmatprep.subr.bf16.mxu0 %v1773_v50 }
 0x22d   :  { %1340 = vmatpush1.bf16.msra.mxu0 %v1771_v51 }
 0x22e   :  { %1341 = vmatprep.subr.bf16.mxu0 %v1776_v52 }
 0x231   :  { %1342 = vmatpush1.bf16.msra.mxu0 %v1774_v53 }
 0x232   :  { %1343 = vmatprep.subr.bf16.mxu0 %v1779_v54 }
 0x235   :  { %1344 = vmatpush1.bf16.msra.mxu0 %v1777_v55 }
 0x236   :  { %1345 = vmatprep.subr.bf16.mxu0 %v1782_v56 }
 0x239   :  { %1346 = vmatpush1.bf16.msra.mxu0 %v1780_v57 }
 0x23a   :  { %1347 = vmatprep.subr.bf16.mxu0 %v1785_v58 }
 0x23d   :  { %1348 = vmatpush1.bf16.msra.mxu0 %v1783_v59 }
 0x23e   :  { %1349 = vmatprep.subr.bf16.mxu0 %v1788_v60 }
 0x241   :  { %1350 = vmatpush2.bf16.msra.mxu0 %v1786_v61 }
 0x242   :  { %1351 = vmatprep.subr.bf16.mxu0 %v1791_v62 }
 0x245   :  { %1352 = vmatpush2.bf16.msra.mxu0 %v1789_v63 }
 0x246   :  { %1353 = vmatprep.subr.bf16.mxu0 %v1794_v0 }
 0x249   :  { %1354 = vmatpush2.bf16.msra.mxu0 %v1792_v1 }
 0x24a   :  { %1355 = vmatprep.subr.bf16.mxu0 %v1797_v2 }
 0x24d   :  { %1356 = vmatpush2.bf16.msra.mxu0 %v1795_v3 }
 0x24e   :  { %1357 = vmatprep.subr.bf16.mxu0 %v1800_v4 }
 0x251   :  { %1358 = vmatpush2.bf16.msra.mxu0 %v1798_v5 }
 0x252   :  { %1359 = vmatprep.subr.bf16.mxu0 %v1803_v6 }
 0x255   :  { %1360 = vmatpush2.bf16.msra.mxu0 %v1801_v7 }
 0x256   :  { %1361 = vmatprep.subr.bf16.mxu0 %v1806_v25 }
 0x259   :  { %1362 = vmatpush2.bf16.msra.mxu0 %v1804_v26 }
 0x25a   :  { %1363 = vmatprep.subr.bf16.mxu0 %v1809_v27 }
 0x25d   :  { %1364 = vmatpush2.bf16.msra.mxu0 %v1807_v28 }
 0x2e0   :  { %v873_v11 = vpop.f32.mrf.mxu0 }
 0x2e1   :  { %v874_v12 = vadd.f32 %v873_v11, %v672_v9 }
 0x2e2   :  { %v875_v13 = vpop.f32.mrf.mxu0 }
 0x2e3   :  { %vm880_vm4 = vcmp.gt.f32.partialorder %v874_v12, 0.0  ;;  %v882_v16 = vmul.f32 0.2, %v874_v12  ;;  %v876_v17 = vadd.f32 %v875_v13, %v676_v10 }
 0x2e4   :  { %v877_v18 = vpop.f32.mrf.mxu0 }
 0x2e5   :  { %vm881_vm5 = vcmp.gt.f32.partialorder %v876_v17, 0.0  ;;  %v883_v19 = vmul.f32 0.2, %v876_v17  ;;  %v884_v20 = vsel %vm880_vm4, %v874_v12, %v882_v16 }
 0x2e6   :  { %v878_v21 = vpop.f32.mrf.mxu0  ;;  %v918_v24 = vpack.c.bf16 %v884_v20, %v884_v20 }
 0x2e7   :  { %v885_v22 = vsel %vm881_vm5, %v876_v17, %v883_v19 }
 0x2e8   :  { %v919_v23 = vpack.c.bf16 %v885_v22, %v885_v22 }
 0x2ea   :  { %1124 = vmatprep.mubr.bf16.mxu1 %v919_v23 }
 0x2eb   :  { %1125 = vmatmul.mubr.bf16.vlgmr.msra.gmra.mxu1 %v918_v24 }
 0x3ab   :  { %v1126_v32 = vpop.f32.mrf.mxu1 }
 0x3ac   :  { %v1127_v33 = vadd.f32 %v1126_v32, %v925_v30 }
 0x3ad   :  { %v1128_v34 = vpop.f32.mrf.mxu1 }
 0x3ae   :  { %vm1133_vm6 = vcmp.gt.f32.partialorder %v1127_v33, 0.0  ;;  %v1135_v35 = vmul.f32 0.2, %v1127_v33  ;;  %v1129_v37 = vadd.f32 %v1128_v34, %v929_v31 }
 0x3af   :  { %v1130_v39 = vpop.f32.mrf.mxu1 }
 0x3b0   :  { %vm1134_vm7 = vcmp.gt.f32.partialorder %v1129_v37, 0.0  ;;  %v1136_v40 = vmul.f32 0.2, %v1129_v37  ;;  %v1137_v41 = vsel %vm1133_vm6, %v1127_v33, %v1135_v35 }
 0x3b1   :  { %v1131_v42 = vpop.f32.mrf.mxu1  ;;  %v1171_v45 = vpack.c.bf16 %v1137_v41, %v1137_v41 }
 0x3b2   :  { %v1138_v43 = vsel %vm1134_vm7, %v1129_v37, %v1136_v40 }
 0x3b3   :  { %v1172_v44 = vpack.c.bf16 %v1138_v43, %v1138_v43 }
 0x3b5   :  { %1365 = vmatprep.mubr.bf16.mxu0 %v1172_v44 }
 0x3b6   :  { %1366 = vmatmul.mubr.bf16.vlgmr.msra.gmra.mxu0 %v1171_v45 }
 0x476   :  { %v1367_v46 = vpop.f32.mrf.mxu0 }
 0x477   :  { %v1368_v36 = vadd.f32 %v2038_v14, %v1367_v46 }
 0x478   :  { %v1369_v38 = vpop.f32.mrf.mxu0 }
 0x479   :  { %v1374_v47 = vmul.f32 100.0, %v1368_v36  ;;  %v1370_v48 = vadd.f32 %v1369_v38, %v2042_v15 }
 0x47a   :  { %v1371_v49 = vpop.f32.mrf.mxu0 }
 0x47b   :  { %1810 = vtanh.f32 %v1374_v47  ;;  %v1375_v50 = vmul.f32 100.0, %v1370_v48 }
 0x47c   :  { %v1372_v51 = vpop.f32.mrf.mxu0 }
 0x47d   :  { %1812 = vtanh.f32 %v1375_v50 }
 0x488   :  { %v1811_v52 = vpop.eup %1810 }
 0x489   :  { %v1378_v54 = vmul.f32 1.05, %v1811_v52 }
 0x48a   :  { %v1813_v53 = vpop.eup %1812 }
 0x48b   :  { %v1379_v55 = vmul.f32 1.05, %v1813_v53 }
 0x48d   :  { %v1382_v56 = vcombine.low %v1378_v54, %v1379_v55 }
 0x48f   :  { %1561 = vst.sshfl [vmem:[%s2087_s10] sm:$0x33 pattern:$0x76325410] %v1382_v56 }
 0x490   :  { %1396 = vsyncpa [#allocation3], 1 }
 0x491   :  { %1397 = vsyncpa [#allocation5], 1 }
 0x492   :  { %1398 = vsyncpa [#allocation8], 1 }
 0x493   :  { %1399 = vsyncpa [#allocation11], 1 }

</bundles_post_ra>
